<compile_context>
chip_gen: v7x
topology: tpu7x:2x2x1
jax: 0.10.0
libtpu: 0.0.40
codegen_flags: <defaults>
</compile_context>

<pallas_src>
import functools

import jax
import jax.numpy as jnp
from jax.experimental import pallas as pl
from jax.experimental.pallas import tpu as pltpu


HEAD_WIDTH = 128  # lane-dense head: cols 0..A-1 = q_raw, col A = row adv-sum, rest 0


def _round_up(n, m):
    return ((n + m - 1) // m) * m


def _is_v5e():
    try:
        kind = jax.devices()[0].device_kind.lower()
    except Exception:
        return False
    return ("v5 lite" in kind) or ("v5e" in kind) or ("v5litepod" in kind)


# ----------------------------------------------------------------------------
# Kernels
# ----------------------------------------------------------------------------

def _finish_head(head_f32, q_ref, psum_ref, *, batch, n_act, tile_b):
    """Store the bf16 head tile + this tile's masked f32 advantage partial sum."""
    q_ref[...] = head_f32.astype(q_ref.dtype)
    row = (pl.program_id(0) * tile_b
           + jax.lax.broadcasted_iota(jnp.int32, (tile_b, 1), 0))
    valid = row < batch                                   # mask padded batch rows
    adv_rowsum = head_f32[:, n_act:n_act + 1]             # (TB, 1) per-row sum_j adv_j
    total = jnp.sum(jnp.where(valid, adv_rowsum, 0.0), axis=0, keepdims=True)  # (1,1)
    psum_ref[0] = total                                    # psum block is (1, 1, 1)


def _dueling_kernel_fused(x_ref, w1_ref, b1_ref, w2_ref, b2_ref, w4_ref, b4_ref,
                          q_ref, psum_ref, *, batch, n_act, tile_b):
    """Fused streams: 3 wide bf16 MXU matmuls (256-wide K/N), f32 accumulation."""
    x = x_ref[...].astype(jnp.bfloat16)                                  # cast in-kernel

    h1 = jnp.dot(x, w1_ref[...], preferred_element_type=jnp.float32) + b1_ref[...]
    h1 = jnp.maximum(h1, 0.0).astype(jnp.bfloat16)                       # (TB, 2*H1)

    h2 = jnp.dot(h1, w2_ref[...], preferred_element_type=jnp.float32) + b2_ref[...]
    h2 = jnp.maximum(h2, 0.0).astype(jnp.bfloat16)                       # (TB, 2*H2)

    head = jnp.dot(h2, w4_ref[...], preferred_element_type=jnp.float32) + b4_ref[...]
    _finish_head(head, q_ref, psum_ref, batch=batch, n_act=n_act, tile_b=tile_b)


def _dueling_kernel_split(x_ref, w1_ref, b1_ref, w2v_ref, w2a_ref, b2_ref,
                          w4_ref, b4_ref, q_ref, psum_ref,
                          *, batch, n_act, tile_b, h1_width, h2_width):
    """v5e variant: layer 2 as two independent 128^2 matmuls (no zero blocks)."""
    H1, H2 = h1_width, h2_width
    x = x_ref[...].astype(jnp.bfloat16)

    h1 = jnp.dot(x, w1_ref[...], preferred_element_type=jnp.float32) + b1_ref[...]
    h1 = jnp.maximum(h1, 0.0).astype(jnp.bfloat16)                       # (TB, 2*H1)

    b2 = b2_ref[...]
    h2v = jnp.maximum(
        jnp.dot(h1[:, :H1], w2v_ref[...], preferred_element_type=jnp.float32)
        + b2[:, :H2], 0.0).astype(jnp.bfloat16)                          # (TB, H2)
    h2a = jnp.maximum(
        jnp.dot(h1[:, H1:], w2a_ref[...], preferred_element_type=jnp.float32)
        + b2[:, H2:], 0.0).astype(jnp.bfloat16)                          # (TB, H2)

    w4 = w4_ref[...]
    head = (jnp.dot(h2v, w4[:H2], preferred_element_type=jnp.float32)
            + jnp.dot(h2a, w4[H2:], preferred_element_type=jnp.float32)
            + b4_ref[...])
    _finish_head(head, q_ref, psum_ref, batch=batch, n_act=n_act, tile_b=tile_b)


# ----------------------------------------------------------------------------
# One-time parameter packing (call ONCE, outside the per-step path)
# ----------------------------------------------------------------------------

def pack_dueling_params(p, *, split_l2=False):
    """Fuse per-stream params. Weights -> bf16, biases f32.

    Head fusion: column j (j < A) = q_raw_j = val + adv_j
                 column A         = per-row sum_j adv_j (for the global mean)
                 columns A+1..127 = 0 (lane padding for unmasked stores).
    """
    S, H1 = p["w1v"].shape
    H2 = p["w2v"].shape[1]
    A = p["w4a"].shape[1]
    assert A + 1 <= HEAD_WIDTH, "action_size + 1 must fit in one 128-lane head"

    w1 = jnp.concatenate([p["w1v"], p["w1a"]], axis=1)                   # (S, 2*H1)
    b1 = jnp.concatenate([p["b1v"], p["b1a"]], axis=1)                   # (1, 2*H1)
    b2 = jnp.concatenate([p["b2v"], p["b2a"]], axis=1)                   # (1, 2*H2)

    w4 = jnp.zeros((2 * H2, HEAD_WIDTH), jnp.float32)
    w4 = w4.at[:H2, :A].set(jnp.broadcast_to(p["w4v"], (H2, A)))         # value -> every action col
    w4 = w4.at[H2:, :A].set(p["w4a"])                                    # advantage stream
    w4 = w4.at[H2:, A].set(p["w4a"].sum(axis=1))                         # row-wise adv sum column
    b4 = jnp.zeros((1, HEAD_WIDTH), jnp.float32)
    b4 = b4.at[:, :A].set(p["b4v"] + p["b4a"])
    b4 = b4.at[:, A].set(jnp.sum(p["b4a"]))

    packed = {
        "w1": w1.astype(jnp.bfloat16), "b1": b1, "b2": b2,
        "w4": w4.astype(jnp.bfloat16), "b4": b4,
    }
    if split_l2:
        packed["w2v"] = p["w2v"].astype(jnp.bfloat16)                    # (H1, H2)
        packed["w2a"] = p["w2a"].astype(jnp.bfloat16)                    # (H1, H2)
    else:
        w2 = jnp.zeros((2 * H1, 2 * H2), jnp.float32)                    # block-diagonal
        w2 = w2.at[:H1, :H2].set(p["w2v"])
        w2 = w2.at[H1:, H2:].set(p["w2a"])
        packed["w2"] = w2.astype(jnp.bfloat16)

    meta = dict(state_size=S, hid1=H1, hid2=H2, action_size=A, split_l2=split_l2)
    return packed, meta


# ----------------------------------------------------------------------------
# Forward
# ----------------------------------------------------------------------------

def dueling_q_forward(x, packed, meta, *, target_tile=1024):
    """x: (B, state_size) f32. packed/meta from pack_dueling_params."""
    B, S = x.shape
    A = meta["action_size"]
    H1, H2 = meta["hid1"], meta["hid2"]
    split_l2 = meta["split_l2"]

    # Batch tiling: balanced tiles, multiple of 16 rows (bf16 sublane pack),
    # >= 2 grid steps when B allows (v7x megacore + pipelining). VMEM is not a
    # constraint at these layer sizes, so tiles are sized for grid-step count.
    n_tiles = max(2, pl.cdiv(B, target_tile))
    tile_b = _round_up(pl.cdiv(B, n_tiles), 16)
    b_pad = _round_up(B, tile_b)
    grid = (b_pad // tile_b,)

    x_in = x if b_pad == B else jnp.pad(x, ((0, b_pad - B), (0, 0)))     # f32; cast in-kernel

    const2 = lambda i: (0, 0)

    if split_l2:
        kernel = functools.partial(_dueling_kernel_split, batch=B, n_act=A,
                                   tile_b=tile_b, h1_width=H1, h2_width=H2)
        weight_args = (packed["w1"], packed["b1"], packed["w2v"], packed["w2a"],
                       packed["b2"], packed["w4"], packed["b4"])
        l2_flops = 2 * b_pad * 2 * (H1 * H2)
    else:
        kernel = functools.partial(_dueling_kernel_fused, batch=B, n_act=A,
                                   tile_b=tile_b)
        weight_args = (packed["w1"], packed["b1"], packed["w2"],
                       packed["b2"], packed["w4"], packed["b4"])
        l2_flops = 2 * b_pad * (2 * H1) * (2 * H2)

    # TODO(synk): weight BlockSpecs could use pipeline_mode=pl.Buffered(1) to skip
    # double-buffering the grid-invariant blocks (minor VMEM saving only).
    in_specs = [pl.BlockSpec((tile_b, S), lambda i: (i, 0))]             # x tile (pipelined)
    in_specs += [pl.BlockSpec(tuple(w.shape), const2) for w in weight_args]

    out_shapes = (
        jax.ShapeDtypeStruct((b_pad, HEAD_WIDTH), jnp.bfloat16),         # lane-dense q_raw slab
        jax.ShapeDtypeStruct((grid[0], 1, 1), jnp.float32),              # per-tile adv partial sums
    )
    out_specs = (
        pl.BlockSpec((tile_b, HEAD_WIDTH), lambda i: (i, 0)),
        pl.BlockSpec((1, 1, 1), lambda i: (i, 0, 0)),
    )

    flops = (2 * b_pad * S * (2 * H1) + l2_flops
             + 2 * b_pad * (2 * H2) * HEAD_WIDTH)
    weight_bytes = sum(int(w.size) * w.dtype.itemsize for w in weight_args)
    bytes_accessed = (int(x_in.size) * 4 + b_pad * HEAD_WIDTH * 2
                      + grid[0] * 4 + weight_bytes)

    q_raw, psums = pl.pallas_call(
        kernel,
        out_shape=out_shapes,
        grid=grid,
        in_specs=in_specs,
        out_specs=out_specs,
        compiler_params=pltpu.CompilerParams(
            dimension_semantics=("parallel",),            # megacore sharding on v7x
            vmem_limit_bytes=32 * 1024 * 1024,
        ),
        cost_estimate=pl.CostEstimate(
            flops=flops, transcendentals=0, bytes_accessed=bytes_accessed),
    )(x_in, *weight_args)

    # Global mean over the WHOLE (B, A) advantage tensor — matches torch `adv.mean()`.
    mean_adv = jnp.sum(psums) / (B * A)
    return q_raw[:B, :A].astype(jnp.float32) - mean_adv


# ----------------------------------------------------------------------------
# Init + pure-JAX reference
# ----------------------------------------------------------------------------

def init_params(key, state_size, action_size, hidsize1=128, hidsize2=128):
    """PyTorch-style uniform(-1/sqrt(fan_in), 1/sqrt(fan_in)) init.
    Weights stored transposed: (in_features, out_features); biases (1, out)."""
    dims = {
        "1v": (state_size, hidsize1),
        "2v": (hidsize1, hidsize2),
        "4v": (hidsize2, 1),
        "1a": (state_size, hidsize1),
        "2a": (hidsize1, hidsize2),
        "4a": (hidsize2, action_size),
    }
    params = {}
    for name, (fan_in, fan_out) in dims.items():
        key, kw, kb = jax.random.split(key, 3)
        bound = 1.0 / jnp.sqrt(float(fan_in))
        params[f"w{name}"] = jax.random.uniform(
            kw, (fan_in, fan_out), jnp.float32, -bound, bound)
        params[f"b{name}"] = jax.random.uniform(
            kb, (1, fan_out), jnp.float32, -bound, bound)
    return params


def reference_forward(x, p):
    """Pure-JAX f32 reference of the original (unfused) PyTorch module."""
    def lin(h, w, b):
        return h @ w + b
    val = jax.nn.relu(lin(x, p["w1v"], p["b1v"]))
    val = jax.nn.relu(lin(val, p["w2v"], p["b2v"]))
    val = lin(val, p["w4v"], p["b4v"])
    adv = jax.nn.relu(lin(x, p["w1a"], p["b1a"]))
    adv = jax.nn.relu(lin(adv, p["w2a"], p["b2a"]))
    adv = lin(adv, p["w4a"], p["b4a"])
    return val + adv - adv.mean()


if __name__ == "__main__":
    B, STATE, ACTIONS = 8, 16, 8
    key = jax.random.PRNGKey(0)
    key, kx = jax.random.split(key)
    x = jax.random.normal(kx, (B, STATE), jnp.float32)
    params = init_params(key, STATE, ACTIONS, hidsize1=128, hidsize2=128)

    # Pack once (outside the per-step path); choose layer-2 layout per chip.
    packed, meta = pack_dueling_params(params, split_l2=_is_v5e())
    fwd = jax.jit(lambda xx, ww: dueling_q_forward(xx, ww, meta))

    out = jax.block_until_ready(fwd(x, packed))

    ref = reference_forward(x, params)
    assert out.shape == (B, ACTIONS)
    # bf16 operands + bf16 head storage (f32 accumulation) vs f32 reference.
    assert jnp.allclose(out, ref, atol=5e-2, rtol=5e-2), "mismatch vs reference"
    print("KERNEL_OK")
</pallas_src>

<mosaic_0001>
module attributes {stable_mosaic.version = 11 : i64} {
  func.func @_dueling_kernel_fused(%arg0: i32, %arg1: memref<16x16xf32, #tpu.memory_space<vmem>>, %arg2: memref<16x256xbf16, #tpu.memory_space<vmem>>, %arg3: memref<1x256xf32, #tpu.memory_space<vmem>>, %arg4: memref<256x256xbf16, #tpu.memory_space<vmem>>, %arg5: memref<1x256xf32, #tpu.memory_space<vmem>>, %arg6: memref<256x128xbf16, #tpu.memory_space<vmem>>, %arg7: memref<1x128xf32, #tpu.memory_space<vmem>>, %arg8: memref<16x128xbf16, #tpu.memory_space<vmem>>, %arg9: memref<1x1x1xf32, #tpu.memory_space<vmem>>) attributes {dimension_semantics = [#tpu.dimension_semantics<parallel>], iteration_bounds = array<i64: 1>, scalar_prefetch = 0 : i64, scratch_operands = 0 : i64, tpu.core_type = #tpu.core_type<tc>, window_params = [{transform_indices = @transform_0, window_bounds = array<i64: 16, 16>}, {pipeline_mode = #tpu.pipeline_mode<synchronous>, transform_indices = @transform_1, window_bounds = array<i64: 16, 256>}, {pipeline_mode = #tpu.pipeline_mode<synchronous>, transform_indices = @transform_2, window_bounds = array<i64: 1, 256>}, {pipeline_mode = #tpu.pipeline_mode<synchronous>, transform_indices = @transform_3, window_bounds = array<i64: 256, 256>}, {pipeline_mode = #tpu.pipeline_mode<synchronous>, transform_indices = @transform_4, window_bounds = array<i64: 1, 256>}, {pipeline_mode = #tpu.pipeline_mode<synchronous>, transform_indices = @transform_5, window_bounds = array<i64: 256, 128>}, {pipeline_mode = #tpu.pipeline_mode<synchronous>, transform_indices = @transform_6, window_bounds = array<i64: 1, 128>}, {transform_indices = @transform_7, window_bounds = array<i64: 16, 128>}, {transform_indices = @transform_8, window_bounds = array<i64: 1, 1, 1>}]} {
    %c0 = arith.constant 0 : index
    %c0_0 = arith.constant 0 : index
    %0 = vector.load %arg1[%c0, %c0_0] : memref<16x16xf32, #tpu.memory_space<vmem>>, vector<16x16xf32>
    %1 = arith.truncf %0 : vector<16x16xf32> to vector<16x16xbf16>
    %c0_1 = arith.constant 0 : index
    %c0_2 = arith.constant 0 : index
    %2 = vector.load %arg2[%c0_1, %c0_2] : memref<16x256xbf16, #tpu.memory_space<vmem>>, vector<16x256xbf16>
    %cst = arith.constant dense<0.000000e+00> : vector<16x256xf32>
    %3 = tpu.matmul %1, %2, %cst {dimension_numbers = #tpu.dot_dimension_numbers<[1], [0], [0], [1], [0, 0, 1, 1], [], []>} : vector<16x16xbf16>, vector<16x256xbf16>, vector<16x256xf32> -> vector<16x256xf32>
    %c0_3 = arith.constant 0 : index
    %c0_4 = arith.constant 0 : index
    %4 = vector.load %arg3[%c0_3, %c0_4] : memref<1x256xf32, #tpu.memory_space<vmem>>, vector<1x256xf32>
    %5 = vector.broadcast %4 : vector<1x256xf32> to vector<16x256xf32>
    %6 = arith.addf %3, %5 : vector<16x256xf32>
    %cst_5 = arith.constant 0.000000e+00 : f32
    %7 = vector.broadcast %cst_5 : f32 to vector<16x256xf32>
    %8 = arith.maximumf %6, %7 : vector<16x256xf32>
    %9 = arith.truncf %8 : vector<16x256xf32> to vector<16x256xbf16>
    %c0_6 = arith.constant 0 : index
    %c0_7 = arith.constant 0 : index
    %10 = vector.load %arg4[%c0_6, %c0_7] : memref<256x256xbf16, #tpu.memory_space<vmem>>, vector<256x256xbf16>
    %cst_8 = arith.constant dense<0.000000e+00> : vector<16x256xf32>
    %11 = tpu.matmul %9, %10, %cst_8 {dimension_numbers = #tpu.dot_dimension_numbers<[1], [0], [0], [1], [0, 0, 1, 1], [], []>} : vector<16x256xbf16>, vector<256x256xbf16>, vector<16x256xf32> -> vector<16x256xf32>
    %c0_9 = arith.constant 0 : index
    %c0_10 = arith.constant 0 : index
    %12 = vector.load %arg5[%c0_9, %c0_10] : memref<1x256xf32, #tpu.memory_space<vmem>>, vector<1x256xf32>
    %13 = vector.broadcast %12 : vector<1x256xf32> to vector<16x256xf32>
    %14 = arith.addf %11, %13 : vector<16x256xf32>
    %cst_11 = arith.constant 0.000000e+00 : f32
    %15 = vector.broadcast %cst_11 : f32 to vector<16x256xf32>
    %16 = arith.maximumf %14, %15 : vector<16x256xf32>
    %17 = arith.truncf %16 : vector<16x256xf32> to vector<16x256xbf16>
    %c0_12 = arith.constant 0 : index
    %c0_13 = arith.constant 0 : index
    %18 = vector.load %arg6[%c0_12, %c0_13] : memref<256x128xbf16, #tpu.memory_space<vmem>>, vector<256x128xbf16>
    %cst_14 = arith.constant dense<0.000000e+00> : vector<16x128xf32>
    %19 = tpu.matmul %17, %18, %cst_14 {dimension_numbers = #tpu.dot_dimension_numbers<[1], [0], [0], [1], [0, 0, 1, 1], [], []>} : vector<16x256xbf16>, vector<256x128xbf16>, vector<16x128xf32> -> vector<16x128xf32>
    %c0_15 = arith.constant 0 : index
    %c0_16 = arith.constant 0 : index
    %20 = vector.load %arg7[%c0_15, %c0_16] : memref<1x128xf32, #tpu.memory_space<vmem>>, vector<1x128xf32>
    %21 = vector.broadcast %20 : vector<1x128xf32> to vector<16x128xf32>
    %22 = arith.addf %19, %21 : vector<16x128xf32>
    %23 = arith.truncf %22 : vector<16x128xf32> to vector<16x128xbf16>
    %c0_17 = arith.constant 0 : index
    %c0_18 = arith.constant 0 : index
    %24 = vector.load %arg8[%c0_17, %c0_18] : memref<16x128xbf16, #tpu.memory_space<vmem>>, vector<16x128xbf16>
    tpu.vector_store %arg8[%c0_17, %c0_18], %23 {strides = array<i32>} : memref<16x128xbf16, #tpu.memory_space<vmem>>, vector<16x128xbf16>,
    %c16_i32 = arith.constant 16 : i32
    %25 = arith.muli %arg0, %c16_i32 : i32
    %26 = tpu.iota {dimensions = array<i32: 0>} : vector<16x1xi32>
    %27 = vector.broadcast %25 : i32 to vector<16x1xi32>
    %28 = arith.addi %27, %26 : vector<16x1xi32>
    %c8_i32 = arith.constant 8 : i32
    %29 = vector.broadcast %c8_i32 : i32 to vector<16x1xi32>
    %30 = arith.cmpi slt, %28, %29 : vector<16x1xi32>
    %31 = vector.extract_strided_slice %22 {offsets = [0, 8], sizes = [16, 1], strides = [1, 1]} : vector<16x128xf32> to vector<16x1xf32>
    %cst_19 = arith.constant 0.000000e+00 : f32
    %32 = vector.broadcast %cst_19 : f32 to vector<16x1xf32>
    %33 = arith.select %30, %31, %32 : vector<16x1xi1>, vector<16x1xf32>
    %cst_20 = arith.constant dense<0.000000e+00> : vector<1xf32>
    %34 = vector.multi_reduction <add>, %33, %cst_20 [0] : vector<16x1xf32> to vector<1xf32>
    %35 = vector.shape_cast %34 : vector<1xf32> to vector<1x1xf32>
    %c0_21 = arith.constant 0 : index
    %c0_22 = arith.constant 0 : index
    %c0_23 = arith.constant 0 : index
    %36 = vector.load %arg9[%c0_21, %c0_22, %c0_23] : memref<1x1x1xf32, #tpu.memory_space<vmem>>, vector<1x1x1xf32>
    %37 = vector.shape_cast %36 : vector<1x1x1xf32> to vector<1x1xf32>
    %38 = vector.shape_cast %35 : vector<1x1xf32> to vector<1x1x1xf32>
    tpu.vector_store %arg9[%c0_21, %c0_22, %c0_23], %38 {strides = array<i32>} : memref<1x1x1xf32, #tpu.memory_space<vmem>>, vector<1x1x1xf32>,
    return
  }
  func.func @transform_0(%arg0: i32) -> (i32, i32) {
    %c0_i32 = arith.constant 0 : i32
    %c0_i32_0 = arith.constant 0 : i32
    return %arg0, %c0_i32 : i32, i32
  }
  func.func @transform_1(%arg0: i32) -> (i32, i32) {
    %c0_i32 = arith.constant 0 : i32
    %c0_i32_0 = arith.constant 0 : i32
    %c0_i32_1 = arith.constant 0 : i32
    return %c0_i32, %c0_i32_0 : i32, i32
  }
  func.func @transform_2(%arg0: i32) -> (i32, i32) {
    %c0_i32 = arith.constant 0 : i32
    %c0_i32_0 = arith.constant 0 : i32
    %c0_i32_1 = arith.constant 0 : i32
    return %c0_i32, %c0_i32_0 : i32, i32
  }
  func.func @transform_3(%arg0: i32) -> (i32, i32) {
    %c0_i32 = arith.constant 0 : i32
    %c0_i32_0 = arith.constant 0 : i32
    %c0_i32_1 = arith.constant 0 : i32
    return %c0_i32, %c0_i32_0 : i32, i32
  }
  func.func @transform_4(%arg0: i32) -> (i32, i32) {
    %c0_i32 = arith.constant 0 : i32
    %c0_i32_0 = arith.constant 0 : i32
    %c0_i32_1 = arith.constant 0 : i32
    return %c0_i32, %c0_i32_0 : i32, i32
  }
  func.func @transform_5(%arg0: i32) -> (i32, i32) {
    %c0_i32 = arith.constant 0 : i32
    %c0_i32_0 = arith.constant 0 : i32
    %c0_i32_1 = arith.constant 0 : i32
    return %c0_i32, %c0_i32_0 : i32, i32
  }
  func.func @transform_6(%arg0: i32) -> (i32, i32) {
    %c0_i32 = arith.constant 0 : i32
    %c0_i32_0 = arith.constant 0 : i32
    %c0_i32_1 = arith.constant 0 : i32
    return %c0_i32, %c0_i32_0 : i32, i32
  }
  func.func @transform_7(%arg0: i32) -> (i32, i32) {
    %c0_i32 = arith.constant 0 : i32
    %c0_i32_0 = arith.constant 0 : i32
    return %arg0, %c0_i32 : i32, i32
  }
  func.func @transform_8(%arg0: i32) -> (i32, i32, i32) {
    %c0_i32 = arith.constant 0 : i32
    %c0_i32_0 = arith.constant 0 : i32
    %c0_i32_1 = arith.constant 0 : i32
    return %arg0, %c0_i32, %c0_i32_0 : i32, i32, i32
  }
}

</mosaic_0001>

<bundles_post_ra>
// kernel: _lambda_.1
= control target key start
LH: loop header
LB: loop body
LE: loop exit
PB: predicated region body
PF: predicated region fallthrough
CT: control target
= control target key end

     0   :  { %14 = vsyncpa [#allocation3], 0  ;;  %s969_s0 = inlined_call_operand.vmem [shape: f32[16,16], index: 0, kind: input, shape index: {}]   ;;  %s970_s1 = inlined_call_operand.vmem [shape: bf16[16,256], index: 1, kind: input, shape index: {}]   ;;  %s971_s2 = inlined_call_operand.vmem [shape: f32[1,256], index: 2, kind: input, shape index: {}]   ;;  %s972_s3 = inlined_call_operand.hbm [shape: bf16[256,256], index: 3, kind: input, shape index: {}]   ;;  %s973_s4 = inlined_call_operand.vmem [shape: f32[1,256], index: 4, kind: input, shape index: {}]   ;;  %s974_s5 = inlined_call_operand.hbm [shape: bf16[256,128], index: 5, kind: input, shape index: {}]   ;;  %s975_s6 = inlined_call_operand.vmem [shape: f32[1,128], index: 6, kind: input, shape index: {}]   ;;  %s976_s7 = inlined_call_operand.vmem [shape: bf16[16,128], index: 7, kind: output, shape index: {0}]   ;;  %s977_s8 = inlined_call_operand.hbm [shape: f32[1,1,1], index: 8, kind: output, shape index: {1}]  }
   0x1   :  { %15 = vsyncpa [#allocation6], 0 }
   0x2   :  { %16 = vsyncpa [#allocation4], 0  ;;  %s855_s27 = smov [#allocation2]   ;;  %s783_s9 = scalar_lea.hbm %s972_s3, 4096 }
   0x3   :  { %s28_s28 = sshll.u32 %s855_s27, 4  ;;  %p784_p0 = scmp.ne.s32.totalorder %s972_s3, %s783_s9  ;;  %s29_s28 = int_to_ptr.vmem [resolvable:$true] %s28_s28 }
   0x4   :  { %p787_p1 = scmp.lt.u32.totalorder %s783_s9, %s972_s3 }
   0x6   :  { %p789_p2 = pnand %p787_p1, %p784_p0 }
   0x8   :  { %792 = shalt.err (!%p789_p2)
}
   0x9   :  { %s793_s14 = scalar_lea.vmem %s29_s28, 4096  ;;  %p798_p4 = scmp.lt.s32.totalorder %s29_s28, %s29_s28 }
   0xa   :  { %p794_p3 = scmp.ne.s32.totalorder %s29_s28, %s793_s14  ;;  %p799_p5 = scmp.lt.s32.totalorder %s793_s14, %s793_s14 }
   0xc   :  { %p800_p6 = por %p799_p5, %p798_p4 }
   0xe   :  { %p801_p7 = pnand %p800_p6, %p794_p3 }
  0x10   :  { %804 = shalt.err (!%p801_p7)
}
  0x11   :  { %s856_s15 = smov 128   ;;  %s857_s16 = smov 8  }
  0x12   :  { %34 = dma.hbm_to_vmem [thread:$0]  %s972_s3, 4096, %s29_s28, [#allocation3], %s856_s15, %s856_s15, %s857_s16  }
  0x13   :  { %s858_s19 = smov [#allocation5]   ;;  %s805_s23 = scalar_lea.hbm %s974_s5, 2048 }
  0x14   :  { %s42_s20 = sshll.u32 %s858_s19, 4  ;;  %p806_p8 = scmp.ne.s32.totalorder %s974_s5, %s805_s23  ;;  %s43_s20 = int_to_ptr.vmem [resolvable:$true] %s42_s20 }
  0x15   :  { %p809_p9 = scmp.lt.u32.totalorder %s805_s23, %s974_s5 }
  0x17   :  { %p811_p10 = pnand %p809_p9, %p806_p8 }
  0x19   :  { %814 = shalt.err (!%p811_p10)
}
  0x1a   :  { %s815_s29 = scalar_lea.vmem %s43_s20, 2048  ;;  %p820_p12 = scmp.lt.s32.totalorder %s43_s20, %s43_s20 }
  0x1b   :  { %p816_p11 = scmp.ne.s32.totalorder %s43_s20, %s815_s29  ;;  %p821_p13 = scmp.lt.s32.totalorder %s815_s29, %s815_s29 }
  0x1d   :  { %p822_p0 = por %p821_p13, %p820_p12 }
  0x1f   :  { %p823_p1 = pnand %p822_p0, %p816_p11 }
  0x21   :  { %826 = shalt.err (!%p823_p1)
}
  0x22   :  { %s859_s3 = smov 64   ;;  %s860_s28 = smov 4  }
  0x23   :  { %48 = dma.hbm_to_vmem [thread:$0]  %s974_s5, 2048, %s43_s20, [#allocation6], %s859_s3, %s859_s3, %s860_s28  }
  0x24   :  { %849 = dma.done.wait [#allocation3], 4096  }
  0x25   :  { %850 = vsyncadd [#allocation3], 4294963200 }
  0x26   :  { %851 = dma.done.wait [#allocation6], 2048  }
  0x27   :  { %852 = vsyncadd [#allocation6], 4294965248  ;;  %v861_v0 = vmov 0   ;;  %v716_v1 = vld [vmem:[%s970_s1 + $0x4] ss:$8 sps:$4 sm:$0xff]   ;;  %vm85_vm0 = vcmask 130048   ;;  %v65_v49 = vlaneseq }
  0x28   :  { %121 = vmatprep.mubr.bf16.mxu0 %v861_v0  ;;  %v718_v2 = vld [vmem:[%s970_s1] ss:$8 sps:$4 sm:$0xff]   ;;  %89 = vmatprep.subr.bf16.mxu0 %v716_v1  ;;  %v719_v6 = vld [vmem:[#allocation2 + $0x4] ss:$8 sps:$4 sm:$0xff]   ;;  %v722_v8 = vld [vmem:[#allocation2 + $0x14] ss:$8 sps:$4 sm:$0xff]  }
  0x29   :  { %v58_v3 = vld [vmem:[%s969_s0] sm:$0xff]  ;;  %v59_v4 = vld [vmem:[%s969_s0 + $0x8] sm:$0xff]  ;;  %90 = vmatpush1.bf16.msra.mxu0 %v718_v2  ;;  %342 = vmatprep.subr.bf16.mxu1 %v719_v6  ;;  %v724_v9 = vld [vmem:[#allocation2 + $0x10] ss:$8 sps:$4 sm:$0xff]   ;;  %v66_v50 = vshrl.u32 %v65_v49, 7  ;;  %vm588_vm1 = vcmask 72768  }
  0x2a   :  { %v60_v5 = vpack.c.bf16 %v59_v4, %v58_v3  ;;  %v721_v7 = vld [vmem:[#allocation2] ss:$8 sps:$4 sm:$0xff]   ;;  %v725_v10 = vld [vmem:[#allocation2 + $0x24] ss:$8 sps:$4 sm:$0xff]   ;;  %v728_v12 = vld [vmem:[#allocation2 + $0x34] ss:$8 sps:$4 sm:$0xff]  }
  0x2b   :  { %343 = vmatpush1.bf16.msra.mxu1 %v721_v7  ;;  %v727_v11 = vld [vmem:[#allocation2 + $0x20] ss:$8 sps:$4 sm:$0xff]   ;;  %v730_v13 = vld [vmem:[#allocation2 + $0x30] ss:$8 sps:$4 sm:$0xff]   ;;  %v731_v14 = vld [vmem:[#allocation2 + $0x44] ss:$8 sps:$4 sm:$0xff]  }
  0x2c   :  { %626 = vmatmul.mubr.msk.bf16.vlgmr.msra.gmra.mrb[0].mxu0 %vm85_vm0, %v60_v5  ;;  %344 = vmatprep.subr.bf16.mxu1 %v722_v8  ;;  %v733_v15 = vld [vmem:[#allocation2 + $0x40] ss:$8 sps:$4 sm:$0xff]   ;;  %v734_v16 = vld [vmem:[#allocation2 + $0x54] ss:$8 sps:$4 sm:$0xff]   ;;  %v736_v17 = vld [vmem:[#allocation2 + $0x50] ss:$8 sps:$4 sm:$0xff]  }
  0x2d   :  { %v737_v18 = vld [vmem:[#allocation2 + $0x64] ss:$8 sps:$4 sm:$0xff]   ;;  %v739_v19 = vld [vmem:[#allocation2 + $0x60] ss:$8 sps:$4 sm:$0xff]   ;;  %v740_v20 = vld [vmem:[#allocation2 + $0x74] ss:$8 sps:$4 sm:$0xff]  }
  0x2e   :  { %v742_v21 = vld [vmem:[#allocation2 + $0x70] ss:$8 sps:$4 sm:$0xff]   ;;  %v743_v22 = vld [vmem:[#allocation2 + $0x84] ss:$8 sps:$4 sm:$0xff]   ;;  %v745_v23 = vld [vmem:[#allocation2 + $0x80] ss:$8 sps:$4 sm:$0xff]  }
  0x2f   :  { %345 = vmatpush1.bf16.msra.mxu1 %v724_v9  ;;  %v746_v24 = vld [vmem:[#allocation2 + $0x94] ss:$8 sps:$4 sm:$0xff]   ;;  %v748_v25 = vld [vmem:[#allocation2 + $0x90] ss:$8 sps:$4 sm:$0xff]   ;;  %v749_v26 = vld [vmem:[#allocation2 + $0xa4] ss:$8 sps:$4 sm:$0xff]  }
  0x30   :  { %346 = vmatprep.subr.bf16.mxu1 %v725_v10  ;;  %v751_v27 = vld [vmem:[#allocation2 + $0xa0] ss:$8 sps:$4 sm:$0xff]   ;;  %v752_v28 = vld [vmem:[#allocation2 + $0xb4] ss:$8 sps:$4 sm:$0xff]   ;;  %v754_v29 = vld [vmem:[#allocation2 + $0xb0] ss:$8 sps:$4 sm:$0xff]  }
  0x31   :  { %v755_v30 = vld [vmem:[#allocation2 + $0xc4] ss:$8 sps:$4 sm:$0xff]   ;;  %v757_v31 = vld [vmem:[#allocation2 + $0xc0] ss:$8 sps:$4 sm:$0xff]   ;;  %v758_v32 = vld [vmem:[#allocation2 + $0xd4] ss:$8 sps:$4 sm:$0xff]  }
  0x32   :  { %v760_v33 = vld [vmem:[#allocation2 + $0xd0] ss:$8 sps:$4 sm:$0xff]   ;;  %v761_v34 = vld [vmem:[#allocation2 + $0xe4] ss:$8 sps:$4 sm:$0xff]   ;;  %v763_v35 = vld [vmem:[#allocation2 + $0xe0] ss:$8 sps:$4 sm:$0xff]  }
  0x33   :  { %347 = vmatpush1.bf16.msra.mxu1 %v727_v11  ;;  %v764_v36 = vld [vmem:[#allocation2 + $0xf4] ss:$8 sps:$4 sm:$0xff]   ;;  %v766_v37 = vld [vmem:[#allocation2 + $0xf0] ss:$8 sps:$4 sm:$0xff]   ;;  %v767_v38 = vld [vmem:[#allocation5 + $0x40] sm:$0xff]   ;;  %v67_v51 = vsub.s32 0, %v66_v50 }
  0x34   :  { %348 = vmatprep.subr.bf16.mxu1 %v728_v12  ;;  %v768_v39 = vld [vmem:[#allocation5] sm:$0xff]   ;;  %v769_v40 = vld [vmem:[#allocation5 + $0x48] sm:$0xff]   ;;  %685 = vmatprep.subr.bf16.mxu0 %v767_v38  ;;  %v771_v42 = vld [vmem:[#allocation5 + $0x50] sm:$0xff]   ;;  %v71_v53 = vsub.s32 1, %v66_v50  ;;  %s863_s21 = smov [#allocation7]   ;;  %vm602_vm2 = vcmask 0  }
  0x35   :  { %686 = vmatpush3.bf16.msra.mxu0 %v768_v39  ;;  %v770_v41 = vld [vmem:[#allocation5 + $0x8] sm:$0xff]   ;;  %v772_v43 = vld [vmem:[#allocation5 + $0x10] sm:$0xff]   ;;  %v773_v44 = vld [vmem:[#allocation5 + $0x58] sm:$0xff]   ;;  %s612_s22 = sshll.u32 %s863_s21, 4  ;;  %s613_s22 = int_to_ptr.vmem [resolvable:$true] %s612_s22 }
  0x36   :  { %687 = vmatprep.subr.bf16.mxu0 %v769_v40  ;;  %v774_v45 = vld [vmem:[#allocation5 + $0x18] sm:$0xff]   ;;  %v775_v46 = vld [vmem:[#allocation5 + $0x60] sm:$0xff]   ;;  %v777_v48 = vld [vmem:[#allocation5 + $0x68] sm:$0xff]   ;;  %s827_s23 = scalar_lea.vmem %s613_s22, 16  ;;  %s831_s24 = scalar_lea.vmem %s613_s22, 32 }
  0x37   :  { %349 = vmatpush1.bf16.msra.mxu1 %v730_v13  ;;  %v776_v47 = vld [vmem:[#allocation5 + $0x20] sm:$0xff]   ;;  %v778_v6 = vld [vmem:[#allocation5 + $0x28] sm:$0xff]   ;;  %v779_v7 = vld [vmem:[#allocation5 + $0x70] sm:$0xff]   ;;  %p828_p2 = scmp.ne.s32.totalorder %s613_s22, %s827_s23  ;;  %p832_p3 = scmp.lt.s32.totalorder %s613_s22, %s613_s22 }
  0x38   :  { %350 = vmatprep.subr.bf16.mxu1 %v731_v14  ;;  %v63_v52 = vld [vmem:[%s971_s2] sm:$0x3]  ;;  %v780_v8 = vld [vmem:[#allocation5 + $0x30] sm:$0xff]   ;;  %v781_v9 = vld [vmem:[#allocation5 + $0x78] sm:$0xff]   ;;  %p833_p4 = scmp.lt.s32.totalorder %s831_s24, %s827_s23 }
  0x39   :  { %688 = vmatpush3.bf16.msra.mxu0 %v770_v41  ;;  %v68_v54 = vrot.slane %v63_v52, %v67_v51  ;;  %v72_v55 = vrot.slane %v63_v52, %v71_v53  ;;  %v782_v10 = vld [vmem:[#allocation5 + $0x38] sm:$0xff]   ;;  %v170_v11 = vld [vmem:[%s973_s4] sm:$0x3] }
  0x3a   :  { %689 = vmatprep.subr.bf16.mxu0 %v771_v42  ;;  %v175_v12 = vrot.slane %v170_v11, %v67_v51  ;;  %v179_v13 = vrot.slane %v170_v11, %v71_v53  ;;  %p834_p5 = por %p833_p4, %p832_p3 }
  0x3b   :  { %351 = vmatpush1.bf16.msra.mxu1 %v733_v15 }
  0x3c   :  { %352 = vmatprep.subr.bf16.mxu1 %v734_v16  ;;  %p835_p6 = pnand %p834_p5, %p828_p2 }
  0x3d   :  { %690 = vmatpush3.bf16.msra.mxu0 %v772_v43 }
  0x3e   :  { %691 = vmatprep.subr.bf16.mxu0 %v773_v44 }
  0x3f   :  { %353 = vmatpush1.bf16.msra.mxu1 %v736_v17 }
  0x40   :  { %354 = vmatprep.subr.bf16.mxu1 %v737_v18 }
  0x41   :  { %692 = vmatpush3.bf16.msra.mxu0 %v774_v45 }
  0x42   :  { %693 = vmatprep.subr.bf16.mxu0 %v775_v46 }
  0x43   :  { %355 = vmatpush1.bf16.msra.mxu1 %v739_v19 }
  0x44   :  { %356 = vmatprep.subr.bf16.mxu1 %v740_v20 }
  0x45   :  { %694 = vmatpush3.bf16.msra.mxu0 %v776_v47 }
  0x46   :  { %695 = vmatprep.subr.bf16.mxu0 %v777_v48 }
  0x47   :  { %357 = vmatpush1.bf16.msra.mxu1 %v742_v21 }
  0x48   :  { %358 = vmatprep.subr.bf16.mxu1 %v743_v22 }
  0x49   :  { %696 = vmatpush3.bf16.msra.mxu0 %v778_v6 }
  0x4a   :  { %697 = vmatprep.subr.bf16.mxu0 %v779_v7 }
  0x4b   :  { %359 = vmatpush1.bf16.msra.mxu1 %v745_v23 }
  0x4c   :  { %360 = vmatprep.subr.bf16.mxu1 %v746_v24 }
  0x4d   :  { %698 = vmatpush3.bf16.msra.mxu0 %v780_v8 }
  0x4e   :  { %699 = vmatprep.subr.bf16.mxu0 %v781_v9 }
  0x4f   :  { %361 = vmatpush1.bf16.msra.mxu1 %v748_v25 }
  0x50   :  { %362 = vmatprep.subr.bf16.mxu1 %v749_v26 }
  0x51   :  { %700 = vmatpush3.bf16.msra.mxu0 %v782_v10 }
  0x53   :  { %363 = vmatpush1.bf16.msra.mxu1 %v751_v27 }
  0x54   :  { %364 = vmatprep.subr.bf16.mxu1 %v752_v28 }
  0x57   :  { %365 = vmatpush1.bf16.msra.mxu1 %v754_v29  ;;  %v659_v29 = vld [vmem:[%s975_s6] ss:$0 sm:$0xff]  ;;  %s862_s6 = smov 120  }
  0x58   :  { %366 = vmatprep.subr.bf16.mxu1 %v755_v30 }
  0x5b   :  { %367 = vmatpush1.bf16.msra.mxu1 %v757_v31 }
  0x5c   :  { %368 = vmatprep.subr.bf16.mxu1 %v758_v32 }
  0x5f   :  { %369 = vmatpush1.bf16.msra.mxu1 %v760_v33 }
  0x60   :  { %370 = vmatprep.subr.bf16.mxu1 %v761_v34 }
  0x63   :  { %371 = vmatpush1.bf16.msra.mxu1 %v763_v35 }
  0x64   :  { %372 = vmatprep.subr.bf16.mxu1 %v764_v36 }
  0x67   :  { %373 = vmatpush1.bf16.msra.mxu1 %v766_v37 }
  0xff   :  { %v123_v56 = vpop.f32.mrb[0].mxu0 }
 0x100   :  { %v124_v57 = vadd.f32 %v123_v56, %v68_v54  ;;  %v125_v58 = vpop.f32.mrb[1].mxu0 }
 0x101   :  { %v126_v59 = vadd.f32 %v125_v58, %v72_v55  ;;  %v127_v60 = vpop.f32.mrb[2].mxu0 }
 0x102   :  { %v128_v61 = vadd.f32 %v127_v60, %v68_v54  ;;  %v129_v62 = vpop.f32.mrb[3].mxu0  ;;  %v132_v0 = vmax.f32 %v124_v57, 0.0 }
 0x103   :  { %v130_v63 = vadd.f32 %v129_v62, %v72_v55  ;;  %v133_v2 = vmax.f32 %v126_v59, 0.0 }
 0x104   :  { %v134_v1 = vmax.f32 %v128_v61, 0.0 }
 0x105   :  { %v135_v3 = vmax.f32 %v130_v63, 0.0 }
 0x106   :  { %v136_v4 = vpack.c.bf16 %v134_v1, %v132_v0 }
 0x107   :  { %v137_v5 = vpack.c.bf16 %v135_v3, %v133_v2 }
 0x109   :  { %374 = vmatprep.mubr.bf16.mxu1 %v137_v5 }
 0x10a   :  { %375 = vmatmul.mubr.bf16.vlgmr.msra.gmra.mrb[0].mxu1 %v136_v4 }
 0x1dd   :  { %v376_v14 = vpop.f32.mrb[0].mxu1 }
 0x1de   :  { %v377_v15 = vadd.f32 %v376_v14, %v175_v12  ;;  %v378_v16 = vpop.f32.mrb[1].mxu1 }
 0x1df   :  { %v379_v17 = vadd.f32 %v378_v16, %v179_v13  ;;  %v380_v18 = vpop.f32.mrb[2].mxu1 }
 0x1e0   :  { %v381_v19 = vadd.f32 %v380_v18, %v175_v12  ;;  %v382_v20 = vpop.f32.mrb[3].mxu1  ;;  %v385_v22 = vmax.f32 %v377_v15, 0.0 }
 0x1e1   :  { %v383_v21 = vadd.f32 %v382_v20, %v179_v13  ;;  %v386_v24 = vmax.f32 %v379_v17, 0.0 }
 0x1e2   :  { %v387_v23 = vmax.f32 %v381_v19, 0.0 }
 0x1e3   :  { %v388_v25 = vmax.f32 %v383_v21, 0.0 }
 0x1e4   :  { %v389_v26 = vpack.c.bf16 %v387_v23, %v385_v22 }
 0x1e5   :  { %v390_v27 = vpack.c.bf16 %v388_v25, %v386_v24 }
 0x1e7   :  { %558 = vmatprep.mubr.bf16.mxu0 %v390_v27 }
 0x1e8   :  { %559 = vmatmul.mubr.bf16.vlgmr.msra.gmra.mrb[4].mxu0 %v389_v26 }
 0x2bb   :  { %v701_v28 = vpop.f32.mrb[4].mxu0 }
 0x2bc   :  { %v702_v30 = vpop.f32.mrb[5].mxu0 }
 0x2bd   :  { %v703_v31 = vadd.f32 %v702_v30, %v701_v28  ;;  %v704_v32 = vpop.f32.mrb[6].mxu0 }
 0x2be   :  { %v705_v33 = vpop.f32.mrb[7].mxu0 }
 0x2bf   :  { %v561_v34 = vadd.f32 %v703_v31, %v659_v29  ;;  %v706_v35 = vadd.f32 %v705_v33, %v704_v32 }
 0x2c1   :  { %v589_v36 = vsel %vm588_vm1, %v561_v34, 0.0  ;;  %v564_v37 = vadd.f32 %v706_v35, %v659_v29 }
 0x2c2   :  { %v592_v38 = vrot.slane %v589_v36, 4 }
 0x2c3   :  { %v683_v39 = vpack.c.bf16 %v564_v37, %v561_v34 }
 0x2c4   :  { %v593_v40 = vadd.f32 %v592_v38, %v589_v36 }
 0x2c5   :  { %684 = vst [vmem:[%s976_s7] sm:$0xff] %v683_v39  }
 0x2c6   :  { %v594_v41 = vrot.slane %v593_v40, 2 }
 0x2c8   :  { %v595_v42 = vadd.f32 %v594_v41, %v593_v40 }
 0x2ca   :  { %v596_v43 = vrot.slane %v595_v42, 1 }
 0x2cc   :  { %v597_v44 = vadd.f32 %v596_v43, %v595_v42 }
 0x2ce   :  { %599 = vrot.lane.b32.xlu0 %v597_v44, %s862_s6 }
 0x340   :  { %v600_v45 = vpop.permute.xlu0 %599 }
 0x341   :  { %603 = vst.msk [vmem:[#allocation7] sm:$0x1] %vm602_vm2, %v600_v45 }
 0x342   :  { %838 = shalt.err (!%p835_p6)
}
 0x343   :  { %s839_s26 = scalar_lea.hbm %s977_s8, 16 }
 0x344   :  { %p840_p7 = scmp.ne.s32.totalorder %s977_s8, %s839_s26  ;;  %p843_p8 = scmp.lt.u32.totalorder %s839_s26, %s977_s8 }
 0x346   :  { %p845_p9 = pnand %p843_p8, %p840_p7 }
 0x348   :  { %848 = shalt.err (!%p845_p9)
}
 0x349   :  { %615 = dma.vmem_to_hbm [thread:$0]  %s613_s22, 16, %s977_s8, [#allocation4]  }
 0x34a   :  { %853 = dma.done.wait [#allocation4], 16  }
 0x34b   :  { %854 = vsyncadd [#allocation4], 4294967280 }
 0x34c   :  { %621 = vsyncpa [#allocation3], 1 }
 0x34d   :  { %622 = vsyncpa [#allocation6], 1 }
 0x34e   :  { %623 = vsyncpa [#allocation4], 1 }

</bundles_post_ra>
